<compile_context>
chip_gen: v5e
topology: v5e:2x2
jax: 0.10.0
libtpu: 0.0.40
codegen_flags: <defaults>
</compile_context>

<pallas_src>
import functools

import jax
import jax.numpy as jnp
from jax import lax
from jax.experimental import pallas as pl
from jax.experimental.pallas import tpu as pltpu

SMOOTHING = 0.1
CONFIDENCE = 1.0 - SMOOTHING


def _label_smoothing_kernel(x_ref, tgt_ref, out_ref, *, n_total):
    # x_ref:   (TN, C) logits block in VMEM (f32 or bf16)
    # tgt_ref: (N_pad, 1) int32 target column, resident (same block every step)
    # out_ref: (1, 8, 128) f32 lane-dense per-block partial-sum tile
    i = pl.program_id(0)
    x = x_ref[...]
    tn, c = x.shape

    # This block's targets, sliced from the resident column.
    start = i * tn
    if tn % 8 == 0:
        start = pl.multiple_of(start, 8)
    tgt = tgt_ref[pl.ds(start, tn), :]                               # (TN, 1) i32

    # Stable LSE pieces: max in the input dtype (exact for bf16); the widen is
    # consumed directly by the subtraction -> single f32 (TN, C) temporary z.
    m = jnp.max(x, axis=-1, keepdims=True)                           # (TN, 1)
    z = x.astype(jnp.float32) - m.astype(jnp.float32)                # (TN, C) f32

    # Fused smoothing weights: w = s/C + conf * onehot(target); compare+select
    # folded, no separate one-hot buffer.  loss = lse - sum(z * w) since
    # confidence + C*(smoothing/C) == 1.
    cls = lax.broadcasted_iota(jnp.int32, (tn, c), 1)                # (TN, C)
    w = jnp.where(cls == tgt, CONFIDENCE + SMOOTHING / c, SMOOTHING / c)
    zw = z * w                                                       # (TN, C) f32

    # Lane reductions on the idle MXU: X @ ones(C, 128), read lane 0.
    ones_r = jnp.ones((c, 128), dtype=jnp.float32)
    se = jnp.dot(jnp.exp(z), ones_r, preferred_element_type=jnp.float32)[:, 0:1]
    swz = jnp.dot(zw, ones_r, preferred_element_type=jnp.float32)[:, 0:1]

    loss = jnp.log(se) - swz                                         # (TN, 1)

    # Mask rows past the true batch size (last block may be padded).
    row = lax.broadcasted_iota(jnp.int32, (tn, 1), 0) + i * tn
    partial = jnp.sum(jnp.where(row < n_total, loss, 0.0))           # scalar f32
    out_ref[...] = jnp.broadcast_to(partial, out_ref.shape)


def _vmem_capacity_bytes():
    try:
        return int(pltpu.get_tpu_info().vmem_capacity_bytes)
    except Exception:
        return 64 << 20  # conservative (v7x-sized) fallback


def _lane_padded(c):
    return max(128, ((c + 127) // 128) * 128)


def _pick_block_rows(n, c, itemsize, vmem_cap):
    """Rows per block, sized against the lane-padded class width max(C, 128)."""
    cp = _lane_padded(c)
    # v5e/v6e (128 MiB VMEM): ~12 MiB of logits per block; v7x (64 MiB): ~5 MiB.
    target_logits_bytes = (12 << 20) if vmem_cap >= (100 << 20) else (5 << 20)
    tn = (target_logits_bytes // max(1, cp * itemsize)) // 8 * 8
    tn = max(8, int(tn))
    if tn >= n:
        if n >= 16:
            # Keep >= 2 blocks so a 2-TensorCore chip (v7x) can shard the
            # "parallel" grid axis; each block stays a multiple of 8 rows.
            tn = max(8, ((pl.cdiv(n, 2) + 7) // 8) * 8)
        else:
            tn = n  # trivial work: single block (block dim == array dim legal)
    return min(tn, n)


def _vmem_limit_bytes(tn, c, itemsize, n_pad, vmem_cap):
    cp = _lane_padded(c)
    need = (
        2 * tn * cp * itemsize      # double-buffered logits block (own dtype)
        + 3 * tn * cp * 4           # f32 temporaries: z, exp(z), z*w
        + cp * 128 * 4              # ones reduction matrix (MXU RHS)
        + 2 * tn * 128 * 4          # MXU reduction results
        + n_pad * 128 * 4           # resident lane-padded target column
        + 2 * 8 * 128 * 4           # double-buffered output tile
        + (2 << 20)                 # compiler scratch headroom
    )
    cap = vmem_cap - (8 << 20)      # stay clearly below physical (56 MiB on v7x)
    return int(min(max(need, 32 << 20), cap))


def label_smoothing_loss(x, target, *, block_rows=None):
    """x: (N, C) float logits (f32 or bf16), target: (N,) int labels -> scalar."""
    n, c = x.shape
    vmem_cap = _vmem_capacity_bytes()
    if block_rows is None:
        block_rows = _pick_block_rows(n, c, x.dtype.itemsize, vmem_cap)
    grid = pl.cdiv(n, block_rows)
    n_pad = grid * block_rows

    # Resident target column, padded to a whole number of blocks; loaded once.
    tgt_col = jnp.pad(target.astype(jnp.int32), (0, n_pad - n)).reshape(n_pad, 1)

    vmem_limit = _vmem_limit_bytes(block_rows, c, x.dtype.itemsize, n_pad, vmem_cap)

    partials = pl.pallas_call(
        functools.partial(_label_smoothing_kernel, n_total=n),
        out_shape=jax.ShapeDtypeStruct((grid, 8, 128), jnp.float32),
        grid_spec=pltpu.PrefetchScalarGridSpec(
            num_scalar_prefetch=0,
            grid=(grid,),
            in_specs=[
                pl.BlockSpec((block_rows, c), lambda i: (i, 0)),  # logits tile
                pl.BlockSpec((n_pad, 1), lambda i: (0, 0)),       # resident targets
            ],
            out_specs=pl.BlockSpec((1, 8, 128), lambda i: (i, 0, 0)),
        ),
        compiler_params=pltpu.CompilerParams(
            dimension_semantics=("parallel",),
            vmem_limit_bytes=vmem_limit,
        ),
    )(x, tgt_col)
    # Tiny final reduction in plain JAX; mean uses the TRUE batch size.
    return jnp.sum(partials[:, 0, 0]) / n


def _reference(x, target):
    logprobs = jax.nn.log_softmax(x.astype(jnp.float32), axis=-1)
    nll = -jnp.take_along_axis(logprobs, target[:, None], axis=-1)[:, 0]
    smooth = -jnp.mean(logprobs, axis=-1)
    return jnp.mean(CONFIDENCE * nll + SMOOTHING * smooth)


if __name__ == "__main__":
    key = jax.random.PRNGKey(0)

    # Case 1: small (batch, num_classes) logits like the module's forward.
    kx, kt = jax.random.split(key)
    N, C = 8, 32
    x = jax.random.normal(kx, (N, C), dtype=jnp.float32)
    target = jax.random.randint(kt, (N,), 0, C, dtype=jnp.int32)
    loss = label_smoothing_loss(x, target)
    jax.block_until_ready(loss)
    ref = _reference(x, target)
    assert jnp.allclose(loss, ref, atol=1e-3, rtol=5e-3), (loss, ref)

    # Case 2: multi-block grid with a padded last block (N % block_rows != 0),
    # exercising the row mask, resident-target slicing and partial-sum path.
    kx2, kt2 = jax.random.split(jax.random.PRNGKey(0), 2)
    N2, C2 = 20, 128
    x2 = jax.random.normal(kx2, (N2, C2), dtype=jnp.float32)
    target2 = jax.random.randint(kt2, (N2,), 0, C2, dtype=jnp.int32)
    loss2 = label_smoothing_loss(x2, target2, block_rows=8)
    jax.block_until_ready(loss2)
    ref2 = _reference(x2, target2)
    assert jnp.allclose(loss2, ref2, atol=1e-3, rtol=5e-3), (loss2, ref2)

    # Case 3: bf16 logits (halved HBM traffic; in-kernel max taken in bf16,
    # auto-split into 2 blocks so a 2-core chip shares the work).
    kx3, kt3 = jax.random.split(jax.random.PRNGKey(1), 2)
    N3, C3 = 24, 256
    x3 = jax.random.normal(kx3, (N3, C3), dtype=jnp.float32).astype(jnp.bfloat16)
    target3 = jax.random.randint(kt3, (N3,), 0, C3, dtype=jnp.int32)
    loss3 = label_smoothing_loss(x3, target3)
    jax.block_until_ready(loss3)
    ref3 = _reference(x3, target3)
    assert jnp.allclose(loss3, ref3, atol=2e-2, rtol=2e-2), (loss3, ref3)

    print("KERNEL_OK")
</pallas_src>

<mosaic_0001>
module attributes {stable_mosaic.version = 11 : i64} {
  func.func @_label_smoothing_kernel(%arg0: i32, %arg1: memref<8x32xf32, #tpu.memory_space<vmem>>, %arg2: memref<8x1xi32, #tpu.memory_space<vmem>>, %arg3: memref<1x8x128xf32, #tpu.memory_space<vmem>>) attributes {dimension_semantics = [#tpu.dimension_semantics<parallel>], iteration_bounds = array<i64: 1>, scalar_prefetch = 0 : i64, scratch_operands = 0 : i64, tpu.core_type = #tpu.core_type<tc>, window_params = [{transform_indices = @transform_0, window_bounds = array<i64: 8, 32>}, {pipeline_mode = #tpu.pipeline_mode<synchronous>, transform_indices = @transform_1, window_bounds = array<i64: 8, 1>}, {transform_indices = @transform_2, window_bounds = array<i64: 1, 8, 128>}]} {
    %c0 = arith.constant 0 : index
    %c0_0 = arith.constant 0 : index
    %0 = vector.load %arg1[%c0, %c0_0] : memref<8x32xf32, #tpu.memory_space<vmem>>, vector<8x32xf32>
    %c8_i32 = arith.constant 8 : i32
    %1 = arith.muli %arg0, %c8_i32 : i32
    %2 = tpu.assume_multiple %1, 8 : i32
    %3 = arith.index_cast %2 : i32 to index
    %c0_1 = arith.constant 0 : index
    %4 = vector.load %arg2[%3, %c0_1] : memref<8x1xi32, #tpu.memory_space<vmem>>, vector<8x1xi32>
    %cst = arith.constant dense<0xFF800000> : vector<8xf32>
    %5 = vector.multi_reduction <maximumf>, %0, %cst [1] : vector<8x32xf32> to vector<8xf32>
    %6 = vector.shape_cast %5 : vector<8xf32> to vector<8x1xf32>
    %7 = vector.broadcast %6 : vector<8x1xf32> to vector<8x32xf32>
    %8 = arith.subf %0, %7 : vector<8x32xf32>
    %9 = tpu.iota {dimensions = array<i32: 1>} : vector<8x32xi32>
    %10 = vector.broadcast %4 : vector<8x1xi32> to vector<8x32xi32>
    %11 = arith.cmpi eq, %9, %10 : vector<8x32xi32>
    %cst_2 = arith.constant 0.903124988 : f32
    %cst_3 = arith.constant 3.125000e-03 : f32
    %12 = vector.broadcast %cst_2 : f32 to vector<8x32xf32>
    %13 = vector.broadcast %cst_3 : f32 to vector<8x32xf32>
    %14 = arith.select %11, %12, %13 : vector<8x32xi1>, vector<8x32xf32>
    %15 = arith.mulf %8, %14 : vector<8x32xf32>
    %cst_4 = arith.constant 1.000000e+00 : f32
    %16 = vector.broadcast %cst_4 : f32 to vector<32x128xf32>
    %17 = math.exp %8 : vector<8x32xf32>
    %cst_5 = arith.constant dense<0.000000e+00> : vector<8x128xf32>
    %18 = tpu.matmul %17, %16, %cst_5 {dimension_numbers = #tpu.dot_dimension_numbers<[1], [0], [0], [1], [0, 0, 1, 1], [], []>} : vector<8x32xf32>, vector<32x128xf32>, vector<8x128xf32> -> vector<8x128xf32>
    %19 = vector.extract_strided_slice %18 {offsets = [0, 0], sizes = [8, 1], strides = [1, 1]} : vector<8x128xf32> to vector<8x1xf32>
    %cst_6 = arith.constant dense<0.000000e+00> : vector<8x128xf32>
    %20 = tpu.matmul %15, %16, %cst_6 {dimension_numbers = #tpu.dot_dimension_numbers<[1], [0], [0], [1], [0, 0, 1, 1], [], []>} : vector<8x32xf32>, vector<32x128xf32>, vector<8x128xf32> -> vector<8x128xf32>
    %21 = vector.extract_strided_slice %20 {offsets = [0, 0], sizes = [8, 1], strides = [1, 1]} : vector<8x128xf32> to vector<8x1xf32>
    %22 = math.log %19 : vector<8x1xf32>
    %23 = arith.subf %22, %21 : vector<8x1xf32>
    %24 = tpu.iota {dimensions = array<i32: 0>} : vector<8x1xi32>
    %c8_i32_7 = arith.constant 8 : i32
    %25 = arith.muli %arg0, %c8_i32_7 : i32
    %26 = vector.broadcast %25 : i32 to vector<8x1xi32>
    %27 = arith.addi %24, %26 : vector<8x1xi32>
    %c8_i32_8 = arith.constant 8 : i32
    %28 = vector.broadcast %c8_i32_8 : i32 to vector<8x1xi32>
    %29 = arith.cmpi slt, %27, %28 : vector<8x1xi32>
    %cst_9 = arith.constant 0.000000e+00 : f32
    %30 = vector.broadcast %cst_9 : f32 to vector<8x1xf32>
    %31 = arith.select %29, %23, %30 : vector<8x1xi1>, vector<8x1xf32>
    %32 = vector.shape_cast %31 : vector<8x1xf32> to vector<1x8x1xf32>
    %cst_10 = arith.constant dense<0.000000e+00> : vector<1xf32>
    %33 = vector.multi_reduction <add>, %32, %cst_10 [1, 2] : vector<1x8x1xf32> to vector<1xf32>
    %34 = vector.shape_cast %33 : vector<1xf32> to vector<1x1x1xf32>
    %35 = vector.extract %34[0, 0, 0] : f32 from vector<1x1x1xf32>
    %36 = vector.broadcast %35 : f32 to vector<1x8x128xf32>
    %c0_11 = arith.constant 0 : index
    %c0_12 = arith.constant 0 : index
    %c0_13 = arith.constant 0 : index
    %37 = vector.load %arg3[%c0_11, %c0_12, %c0_13] : memref<1x8x128xf32, #tpu.memory_space<vmem>>, vector<1x8x128xf32>
    tpu.vector_store %arg3[%c0_11, %c0_12, %c0_13], %36 {strides = array<i32>} : memref<1x8x128xf32, #tpu.memory_space<vmem>>, vector<1x8x128xf32>,
    return
  }
  func.func @transform_0(%arg0: i32) -> (i32, i32) {
    %c0_i32 = arith.constant 0 : i32
    %c0_i32_0 = arith.constant 0 : i32
    return %arg0, %c0_i32 : i32, i32
  }
  func.func @transform_1(%arg0: i32) -> (i32, i32) {
    %c0_i32 = arith.constant 0 : i32
    %c0_i32_0 = arith.constant 0 : i32
    %c0_i32_1 = arith.constant 0 : i32
    return %c0_i32, %c0_i32_0 : i32, i32
  }
  func.func @transform_2(%arg0: i32) -> (i32, i32, i32) {
    %c0_i32 = arith.constant 0 : i32
    %c0_i32_0 = arith.constant 0 : i32
    %c0_i32_1 = arith.constant 0 : i32
    return %arg0, %c0_i32, %c0_i32_0 : i32, i32, i32
  }
}

</mosaic_0001>

<bundles_post_ra>
// kernel: tpu_custom_call.1
= control target key start
LH: loop header
LB: loop body
LE: loop exit
PB: predicated region body
PF: predicated region fallthrough
CT: control target
= control target key end

     0   :  { %vm16_vm0 = vcmask 261120   ;;  %s185_s0 = inlined_call_operand.vmem [shape: f32[8,32], index: 0, kind: input, shape index: {}]   ;;  %s186_s1 = inlined_call_operand.vmem [shape: s32[8,1], index: 1, kind: input, shape index: {}]   ;;  %s187_s2 = inlined_call_operand.hbm [shape: f32[1,8,128], index: 2, kind: output, shape index: {}]  }
   0x1   :  { %v12_v0 = vld [vmem:[%s185_s0] sm:$0xff] }
   0x2   :  { %7 = vsyncpa [#allocation3], 0  ;;  %v17_v1 = vsel %vm16_vm0, %v12_v0, -inf  ;;  %v154_v2 = vmov 0   ;;  %v15_v3 = vld [vmem:[%s186_s1] sm:$0xff]  ;;  %v155_v4 = vmov 1.0   ;;  %v21_v9 = vlaneseq }
   0x3   :  { %123 = vset.pattern.permute.xlu0 %v154_v2  ;;  %46 = vmatpush.msra.mxu0 %v155_v4  ;;  %v156_v12 = vmov 0.003125   ;;  %vm86_vm2 = vcmask 7168   ;;  %s157_s0 = smov [#allocation2]   ;;  %s106_s15 = sshll.u32 %s187_s2, 4  ;;  %s107_s15 = int_to_ptr.hbm [resolvable:$true] %s106_s15 }
   0x4   :  { %18 = vmax.xlane.f32.xlu0 %v17_v1  ;;  %69 = vmatpush.msra.mxu1 %v155_v4  ;;  %v22_v10 = vand.u32 127, %v21_v9  ;;  %s104_s1 = sshll.u32 %s157_s0, 4  ;;  %s105_s1 = int_to_ptr.vmem [resolvable:$true] %s104_s1 }
   0x5   :  { %47 = vmatpush.msra.mxu0 %v155_v4 }
   0x6   :  { %70 = vmatpush.msra.mxu1 %v155_v4 }
   0x7   :  { %48 = vmatpush.msra.mxu0 %v155_v4 }
   0x8   :  { %71 = vmatpush.msra.mxu1 %v155_v4 }
   0x9   :  { %49 = vmatpush.msra.mxu0 %v155_v4 }
   0xa   :  { %72 = vmatpush.msra.mxu1 %v155_v4 }
  0x18   :  { %24 = vperm.xlu0 %123, %v15_v3  }
  0x77   :  { %v19_v5 = vpop.xlane.xlu0 %18 }
  0x78   :  { %v20_v6 = vsub.f32 %v12_v0, %v19_v5 }
  0x7a   :  { %v29_v7 = vmul.f32 1.442695, %v20_v6 }
  0x7c   :  { %124 = vpow2.f32 %v29_v7 }
  0x82   :  { %v125_v8 = vpop.eup %124 }
  0x83   :  { %115 = vmatmul.msk.f32.vlgmr.msra.gmra.mxu0 %vm16_vm0, %v125_v8 }
  0x8a   :  { %v25_v11 = vpop.permute.xlu0 %24 }
  0x8b   :  { %vm26_vm1 = vcmp.eq.s32.totalorder %v22_v10, %v25_v11 }
  0x8c   :  { %v27_v13 = vsel %vm26_vm1, 0.903125, %v156_v12 }
  0x8d   :  { %v28_v14 = vmul.f32 %v27_v13, %v20_v6 }
  0x8f   :  { %116 = vmatmul.msk.f32.vlgmr.msra.gmra.mxu1 %vm16_vm0, %v28_v14 }
 0x100   :  { %v51_v15 = vpop.f32.mrf.mxu0 }
 0x101   :  { %126 = vlog2.f32 %v51_v15 }
 0x107   :  { %v127_v16 = vpop.eup %126 }
 0x108   :  { %v78_v17 = vmul.f32 0.6931472, %v127_v16 }
 0x10c   :  { %v74_v18 = vpop.f32.mrf.mxu1 }
 0x10d   :  { %v79_v19 = vsub.f32 %v78_v17, %v74_v18 }
 0x10f   :  { %v87_v20 = vsel %vm86_vm2, %v79_v19, 0.0 }
 0x110   :  { %88 = vadd.xlane.f32.xlu1 %v87_v20 }
 0x183   :  { %v89_v21 = vpop.xlane.xlu1 %88 }
 0x184   :  { %v90_v22 = vrot.slane %v89_v21, 4 }
 0x186   :  { %v91_v23 = vadd.f32 %v90_v22, %v89_v21 }
 0x188   :  { %v92_v24 = vrot.slane %v91_v23, 2 }
 0x18a   :  { %v93_v25 = vadd.f32 %v92_v24, %v91_v23 }
 0x18c   :  { %v94_v26 = vrot.slane %v93_v25, 1 }
 0x18e   :  { %v95_v27 = vadd.f32 %v94_v26, %v93_v25 }
 0x190   :  { %117 = vpush %v95_v27 }
 0x1c1   :  { %s118_s16 = spop %117 }
 0x1c2   :  { %v97_v28 = vstv %s118_s16 }
 0x1c3   :  { %98 = vst [vmem:[#allocation2] sm:$0xff] %v97_v28 }
 0x1c4   :  { %109 = dma.vmem_to_hbm [thread:$0]  %s105_s1, 128, %s107_s15, [#allocation3]  }
 0x1c5   :  { %152 = dma.done.wait [#allocation3], 128  }
 0x1c6   :  { %153 = vsyncadd [#allocation3], 4294967168 }
 0x1c7   :  { %114 = vsyncpa [#allocation3], 1 }

</bundles_post_ra>
